<compile_context>
chip_gen: v6e
topology: v6e:2x2x1
jax: 0.10.0
libtpu: 0.0.40
codegen_flags: <defaults>
</compile_context>

<pallas_src>
import math

import jax
import jax.numpy as jnp
import numpy as np
from jax import lax
from jax.experimental import pallas as pl
from jax.experimental.pallas import tpu as pltpu

BN_EPS = 1e-5
_VMEM_LIMIT = 48 * 1024 * 1024        # scoped VMEM cap: safe on v7x (64 MiB) and v5e/v6e (128 MiB)
_TILE_VMEM_BUDGET = 16 * 1024 * 1024  # target live bytes per phase-2 tile (well under the cap)


def _erf(x):
    # Abramowitz & Stegun 7.1.26 polynomial approximation of erf (|err| < 1.5e-7).
    a1, a2, a3, a4, a5 = 0.254829592, -0.284496736, 1.421413741, -1.453152027, 1.061405429
    p = 0.3275911
    s = jnp.where(x < 0.0, -1.0, 1.0)
    ax = jnp.abs(x)
    d = 1.0 + p * ax
    # EUP approx reciprocal + one Newton step: divide off the VALU path, ~f32 accuracy.
    t = pl.reciprocal(d, approx=True)
    t = t * (2.0 - d * t)
    poly = ((((a5 * t + a4) * t + a3) * t + a2) * t + a1) * t
    return s * (1.0 - poly * jnp.exp(-ax * ax))


def _gelu_exact(x):
    return 0.5 * x * (1.0 + _erf(x * (1.0 / np.sqrt(2.0))))


def _bn_stats_kernel(x_ref, stats_ref):
    """Accumulate per-channel [sum, sum_sq] over the lane (N*L) axis into a resident (C, 2) block."""
    @pl.when(pl.program_id(0) == 0)
    def _():
        stats_ref[...] = jnp.zeros_like(stats_ref)

    x = x_ref[...].astype(jnp.float32)                    # (C, T)
    s = jnp.sum(x, axis=1, keepdims=True)                 # (C, 1)
    s2 = jnp.sum(x * x, axis=1, keepdims=True)            # (C, 1)
    stats_ref[...] += jnp.concatenate([s, s2], axis=1)    # one fused += per grid step


def _make_fused_kernel(L, mxu_dtype):
    def kernel(x_ref, scale_ref, shift_ref, w_ref, b_ref, out_ref):
        x = x_ref[...]                                    # (C, T), T a multiple of L
        C, T = x.shape

        # --- BatchNorm1d (precomputed per-channel scale/shift) + exact GELU, in f32 ---
        h = _gelu_exact(x.astype(jnp.float32) * scale_ref[...] + shift_ref[...])
        hm = h.astype(mxu_dtype)

        # --- Conv taps via XLU lane rotation + per-segment (length-L) boundary masks ---
        pos = lax.broadcasted_iota(jnp.int32, hm.shape, 1) % L
        zero = jnp.zeros_like(hm)
        h_m1 = jnp.where(pos >= 1, pltpu.roll(hm, shift=1, axis=1), zero)          # h[l-1]
        h_p1 = jnp.where(pos <= L - 2, pltpu.roll(hm, shift=T - 1, axis=1), zero)  # h[l+1]

        # --- Conv1d(C -> G, k=3, pad=1): three (G,C)@(C,T) MXU calls into one f32 accumulator ---
        y = jnp.dot(w_ref[0], h_m1, preferred_element_type=jnp.float32)
        y = y + jnp.dot(w_ref[1], hm, preferred_element_type=jnp.float32)
        y = y + jnp.dot(w_ref[2], h_p1, preferred_element_type=jnp.float32)
        y = y + b_ref[...]                                # (G, 1) broadcast over lanes

        # --- concat([x, conv(x)], channel axis) as two direct slice-stores ---
        out_ref[:C, :] = x.astype(out_ref.dtype)
        # TODO(synk): pad C/G to sublane multiples wrapper-side so this store is fully unmasked.
        out_ref[C:, :] = y.astype(out_ref.dtype)

    return kernel


def _choose_col_tile(total_cols, L, bytes_per_col):
    """Largest lane tile that is a multiple of L (conv segments) and 128 (lane alignment),
    divides total_cols, and fits the VMEM budget; prefers >= 2 grid steps (v7x megacore)."""
    unit = (L * 128) // math.gcd(L, 128)
    if total_cols % unit != 0 or total_cols == unit:
        # TODO(synk): general halo / ragged lane tiling; fall back to a single full-width tile.
        return total_cols
    n_units = total_cols // unit
    max_units = max(1, _TILE_VMEM_BUDGET // (bytes_per_col * unit))
    divisors = [k for k in range(1, n_units + 1) if n_units % k == 0 and k <= max_units]
    if not divisors:
        return unit
    multi = [k for k in divisors if n_units // k >= 2]    # keep >= 2 grid steps when possible
    return (max(multi) if multi else max(divisors)) * unit


def dense_layer(x, gamma, beta, w, b, *, mxu_dtype=jnp.bfloat16):
    """x: (N, C, L); gamma/beta: (1, C, 1); w: (G, C, 3); b: (1, G, 1) -> (N, C+G, L).

    BatchNorm1d (training-mode batch stats) -> exact GELU -> Conv1d(k=3, pad=1) -> concat([x, y]).
    mxu_dtype=jnp.bfloat16 (default) targets the bf16-native MXU on v6e/v7x; pass jnp.float32 for
    strict numerical agreement with the exact reference.
    """
    N, C, L = x.shape
    G = w.shape[0]
    total = N * L

    # Lane-dense layout (layout plumbing, XLA side): channels on sublanes, batch*length on lanes.
    x2 = jnp.transpose(x, (1, 0, 2)).reshape(C, total)

    mxu_bytes = np.dtype(mxu_dtype).itemsize
    in_bytes = np.dtype(x.dtype).itemsize
    bytes_per_col = (2 * in_bytes * C            # double-buffered input block
                     + 2 * in_bytes * (C + G)    # double-buffered output block
                     + 4 * C                     # h (f32)
                     + 3 * mxu_bytes * C         # hm, h_m1, h_p1
                     + 4 * C                     # iota / boundary mask
                     + 4 * G)                    # f32 matmul accumulator
    tile = _choose_col_tile(total, L, bytes_per_col)
    grid_n = total // tile

    # ---------- Phase 1: per-channel batch statistics (resident (C, 2) accumulator) ----------
    stats = pl.pallas_call(
        _bn_stats_kernel,
        out_shape=jax.ShapeDtypeStruct((C, 2), jnp.float32),
        grid_spec=pltpu.PrefetchScalarGridSpec(
            num_scalar_prefetch=0,
            grid=(grid_n,),
            in_specs=[pl.BlockSpec((C, tile), lambda i: (0, i))],
            out_specs=pl.BlockSpec((C, 2), lambda i: (0, 0)),
        ),
        compiler_params=pltpu.CompilerParams(
            dimension_semantics=("arbitrary",),   # reduction into a resident accumulator block
            vmem_limit_bytes=_VMEM_LIMIT,
        ),
    )(x2)

    # BN scale/shift precomputed once (tiny XLA ops) so phase 2 does a single fused multiply-add.
    inv_count = 1.0 / float(total)
    mean = stats[:, 0] * inv_count
    var = stats[:, 1] * inv_count - mean * mean            # biased variance (PyTorch train mode)
    g1 = gamma.reshape(C).astype(jnp.float32)
    scale_v = g1 * lax.rsqrt(var + BN_EPS)                 # (C,)
    shift_v = beta.reshape(C).astype(jnp.float32) - mean * scale_v
    scale = scale_v.reshape(C, 1)
    shift = shift_v.reshape(C, 1)

    # Conv weights as 3 taps of (G, C); cast wrapper-side to the MXU dtype (halves weight DMA).
    w_taps = jnp.transpose(w, (2, 0, 1)).astype(mxu_dtype)  # tap k pairs with h[l-1+k]
    b2 = b.reshape(G, 1).astype(jnp.float32)

    # ---------- Phase 2: BN + GELU + conv + channel concat, tiled over lanes ----------
    out2 = pl.pallas_call(
        _make_fused_kernel(L, mxu_dtype),
        out_shape=jax.ShapeDtypeStruct((C + G, total), x.dtype),
        grid_spec=pltpu.PrefetchScalarGridSpec(
            num_scalar_prefetch=0,
            grid=(grid_n,),
            in_specs=[
                pl.BlockSpec((C, tile), lambda i: (0, i)),
                pl.BlockSpec((C, 1), lambda i: (0, 0)),
                pl.BlockSpec((C, 1), lambda i: (0, 0)),
                pl.BlockSpec((3, G, C), lambda i: (0, 0, 0)),
                pl.BlockSpec((G, 1), lambda i: (0, 0)),
            ],
            out_specs=pl.BlockSpec((C + G, tile), lambda i: (0, i)),
        ),
        compiler_params=pltpu.CompilerParams(
            dimension_semantics=("parallel",),    # independent lane tiles -> megacore on v7x
            vmem_limit_bytes=_VMEM_LIMIT,
        ),
    )(x2, scale, shift, w_taps, b2)

    return jnp.transpose(out2.reshape(C + G, N, L), (1, 0, 2))


def dense_layer_ref(x, gamma, beta, w, b):
    # Pure-JAX reference for validation.
    mean = jnp.mean(x, axis=(0, 2), keepdims=True)
    var = jnp.mean((x - mean) ** 2, axis=(0, 2), keepdims=True)
    h = (x - mean) / jnp.sqrt(var + BN_EPS) * gamma + beta
    h = jax.nn.gelu(h, approximate=False)
    hp = jnp.pad(h, ((0, 0), (0, 0), (1, 1)))
    y = sum(jnp.einsum('gc,ncl->ngl', w[:, :, k], hp[:, :, k:k + x.shape[2]]) for k in range(3))
    y = y + b
    return jnp.concatenate([x, y], axis=1)


if __name__ == "__main__":
    N, C, L, G = 2, 4, 16, 8   # batch, in_channels, seq length, growth_rate

    key = jax.random.PRNGKey(0)
    kx, kg, kb, kw, kbias = jax.random.split(key, 5)

    x = jax.random.normal(kx, (N, C, L), dtype=jnp.float32)
    # BatchNorm1d affine params (PyTorch default gamma=1, beta=0; perturb for a stricter test).
    gamma = (1.0 + 0.1 * jax.random.normal(kg, (1, C, 1))).astype(jnp.float32)
    beta = (0.1 * jax.random.normal(kb, (1, C, 1))).astype(jnp.float32)
    # Conv1d params (shapes per nn.Conv1d(C, G, 3)), deterministic synthetic init.
    bound = 1.0 / np.sqrt(C * 3)
    w = jax.random.uniform(kw, (G, C, 3), minval=-bound, maxval=bound, dtype=jnp.float32)
    b = jax.random.uniform(kbias, (1, G, 1), minval=-bound, maxval=bound, dtype=jnp.float32)

    ref = jax.block_until_ready(dense_layer_ref(x, gamma, beta, w, b))

    # Strict check with f32 MXU operands.
    out_f32 = jax.block_until_ready(dense_layer(x, gamma, beta, w, b, mxu_dtype=jnp.float32))
    assert out_f32.shape == (N, C + G, L), out_f32.shape
    np.testing.assert_allclose(np.asarray(out_f32), np.asarray(ref), rtol=1e-4, atol=1e-4)

    # Default path (bf16 MXU operands, recommended on v6e/v7x) with loosened tolerance.
    out = jax.block_until_ready(dense_layer(x, gamma, beta, w, b))
    assert out.shape == (N, C + G, L), out.shape
    np.testing.assert_allclose(np.asarray(out), np.asarray(ref), rtol=2e-2, atol=2e-2)

    print("KERNEL_OK")
</pallas_src>

<mosaic_0001>
module attributes {stable_mosaic.version = 11 : i64} {
  func.func @_bn_stats_kernel(%arg0: i32, %arg1: memref<4x32xf32, #tpu.memory_space<vmem>>, %arg2: memref<4x2xf32, #tpu.memory_space<vmem>>) attributes {dimension_semantics = [#tpu.dimension_semantics<arbitrary>], iteration_bounds = array<i64: 1>, scalar_prefetch = 0 : i64, scratch_operands = 0 : i64, tpu.core_type = #tpu.core_type<tc>, window_params = [{transform_indices = @transform_0, window_bounds = array<i64: 4, 32>}, {pipeline_mode = #tpu.pipeline_mode<synchronous>, transform_indices = @transform_1, window_bounds = array<i64: 4, 2>}]} {
    %c0_i32 = arith.constant 0 : i32
    %0 = arith.cmpi eq, %arg0, %c0_i32 : i32
    %1 = arith.extui %0 : i1 to i32
    %c0_i32_0 = arith.constant 0 : i32
    %2 = arith.cmpi ne, %1, %c0_i32_0 : i32
    scf.if %2 {
      %cst_7 = arith.constant 0.000000e+00 : f32
      %13 = vector.broadcast %cst_7 : f32 to vector<4x2xf32>
      %c0_8 = arith.constant 0 : index
      %c0_9 = arith.constant 0 : index
      %14 = vector.load %arg2[%c0_8, %c0_9] : memref<4x2xf32, #tpu.memory_space<vmem>>, vector<4x2xf32>
      tpu.vector_store %arg2[%c0_8, %c0_9], %13 {strides = array<i32>} : memref<4x2xf32, #tpu.memory_space<vmem>>, vector<4x2xf32>,
    } else {
    }
    %c0 = arith.constant 0 : index
    %c0_1 = arith.constant 0 : index
    %3 = vector.load %arg1[%c0, %c0_1] : memref<4x32xf32, #tpu.memory_space<vmem>>, vector<4x32xf32>
    %cst = arith.constant dense<0.000000e+00> : vector<4xf32>
    %4 = vector.multi_reduction <add>, %3, %cst [1] : vector<4x32xf32> to vector<4xf32>
    %5 = vector.shape_cast %4 : vector<4xf32> to vector<4x1xf32>
    %6 = arith.mulf %3, %3 : vector<4x32xf32>
    %cst_2 = arith.constant dense<0.000000e+00> : vector<4xf32>
    %7 = vector.multi_reduction <add>, %6, %cst_2 [1] : vector<4x32xf32> to vector<4xf32>
    %8 = vector.shape_cast %7 : vector<4xf32> to vector<4x1xf32>
    %c0_3 = arith.constant 0 : index
    %c0_4 = arith.constant 0 : index
    %9 = vector.load %arg2[%c0_3, %c0_4] : memref<4x2xf32, #tpu.memory_space<vmem>>, vector<4x2xf32>
    %10 = tpu.concatenate %5, %8 in 1 : vector<4x1xf32>, vector<4x1xf32> -> vector<4x2xf32>
    %11 = arith.addf %9, %10 : vector<4x2xf32>
    %c0_5 = arith.constant 0 : index
    %c0_6 = arith.constant 0 : index
    %12 = vector.load %arg2[%c0_5, %c0_6] : memref<4x2xf32, #tpu.memory_space<vmem>>, vector<4x2xf32>
    tpu.vector_store %arg2[%c0_5, %c0_6], %11 {strides = array<i32>} : memref<4x2xf32, #tpu.memory_space<vmem>>, vector<4x2xf32>,
    return
  }
  func.func @transform_0(%arg0: i32) -> (i32, i32) {
    %c0_i32 = arith.constant 0 : i32
    %c0_i32_0 = arith.constant 0 : i32
    return %c0_i32, %arg0 : i32, i32
  }
  func.func @transform_1(%arg0: i32) -> (i32, i32) {
    %c0_i32 = arith.constant 0 : i32
    %c0_i32_0 = arith.constant 0 : i32
    %c0_i32_1 = arith.constant 0 : i32
    return %c0_i32, %c0_i32_0 : i32, i32
  }
}

</mosaic_0001>

<bundles_post_ra>
// kernel: tpu_custom_call.1
= control target key start
LH: loop header
LB: loop body
LE: loop exit
PB: predicated region body
PF: predicated region fallthrough
CT: control target
= control target key end

     0   :  { %6 = vsyncpa [#allocation3], 0  ;;  %s70_s6 = smov [#allocation2]   ;;  %s96_s0 = inlined_call_operand.hbm [shape: f32[4,32], index: 0, kind: input, shape index: {}]   ;;  %s97_s1 = inlined_call_operand.vmem [shape: f32[4,2], index: 1, kind: output, shape index: {}]  }
   0x1   :  { %s13_s7 = sshll.u32 %s70_s6, 4  ;;  %s14_s7 = int_to_ptr.vmem [resolvable:$true] %s13_s7 }
   0x2   :  { %s56_s8 = scalar_lea.vmem %s14_s7, 64  ;;  %p61_p1 = scmp.lt.s32.totalorder %s14_s7, %s14_s7 }
   0x3   :  { %p57_p0 = scmp.ne.s32.totalorder %s14_s7, %s56_s8  ;;  %p62_p2 = scmp.lt.s32.totalorder %s56_s8, %s56_s8 }
   0x5   :  { %p63_p3 = por %p62_p2, %p61_p1 }
   0x7   :  { %p64_p4 = pnand %p63_p3, %p57_p0 }
   0x9   :  { %67 = shalt.err (!%p64_p4)
}
   0xa   :  { %16 = dma.hbm_to_vmem [thread:$0]  %s96_s0, 64, %s14_s7, [#allocation3]  }
   0xb   :  { %68 = dma.done.wait [#allocation3], 64  }
   0xc   :  { %69 = vsyncadd [#allocation3], 4294967232  ;;  %vm24_vm0 = vcmask 11264   ;;  %v71_v0 = vmov 0.0   ;;  %vm27_vm1 = vcmask 257024   ;;  %vm36_vm2 = vcmask 7168  }
   0xd   :  { %25 = vst.msk [vmem:[%s97_s1] sm:$0xf] %vm24_vm0, %v71_v0  ;;  %v26_v1 = vld [vmem:[#allocation2] sm:$0xf] }
   0xe   :  { %v28_v2 = vsel %vm27_vm1, %v26_v1, 0.0  ;;  %v31_v3 = vmul.f32 %v26_v1, %v26_v1 }
   0xf   :  { %29 = vadd.xlane.f32.xlu0 %v28_v2 }
  0x10   :  { %v32_v4 = vsel %vm27_vm1, %v31_v3, 0.0 }
  0x13   :  { %33 = vadd.xlane.f32.xlu0 %v32_v4 }
  0x14   :  { %v35_v6 = vld [vmem:[%s97_s1] sm:$0xf] }
  0x98   :  { %v30_v5 = vpop.xlane.xlu0 %29 }
  0x9c   :  { %v34_v7 = vpop.xlane.xlu0 %33 }
  0x9d   :  { %v37_v8 = vsel %vm36_vm2, %v30_v5, %v34_v7 }
  0x9e   :  { %v38_v9 = vadd.f32 %v37_v8, %v35_v6 }
  0xa0   :  { %40 = vst.msk [vmem:[%s97_s1] sm:$0xf] %vm24_vm0, %v38_v9 }
  0xa1   :  { %45 = vsyncpa [#allocation3], 1 }

</bundles_post_ra>
